<compile_context>
chip_gen: v7x
topology: tpu7x:2x2x1
jax: 0.10.0
libtpu: 0.0.40
codegen_flags: <defaults>
</compile_context>

<pallas_src>
import functools

import jax
import jax.numpy as jnp
from jax import lax
from jax.experimental import pallas as pl
from jax.experimental.pallas import tpu as pltpu

HIDDEN = 32     # hidden_size
OUTPUT = 64     # output_size (vocab)

_UNROLL_MAX = 32   # fully unroll in-kernel loops up to this many steps


def _decoder_kernel(T,                       # static: number of valid time steps
                    tok_ref,                 # SMEM scalar-prefetch: (T,) token ids
                    emb_ref,                 # (O, H)    embedding table (resident)
                    h0_ref,                  # (1, H)    initial hidden
                    wx_ref,                  # (H, 4H)   packed x-side GRU weights [ir|iz|in|0]
                    wh_ref,                  # (H, 4H)   packed h-side GRU weights [hr|hz|0|hn]
                    bg_ref,                  # (1, 4H)   packed biases [br|bz|b_in|b_hn]
                    wo_ref,                  # (H, OP)   W_out^T, lane-padded
                    bo_ref,                  # (1, OP)   b_out, pad cols = -1e30
                    logp_ref,                # (T_pad, OP) out: per-step log-probs
                    hfin_ref,                # (1, H)      out: final hidden
                    x_scr,                   # (T_pad, H)  scratch: relu(emb[tok])
                    gx_scr,                  # (T_pad, 4H) scratch: x-side gate pre-activations
                    hs_scr):                 # (T_pad, H)  scratch: all hidden states
    H = h0_ref.shape[1]
    T_pad = x_scr.shape[0]

    # ------------- pre-loop: batched x-side path (off the serial chain) -------------
    if T != T_pad:                           # only pad rows need deterministic zeros
        x_scr[...] = jnp.zeros_like(x_scr)
        hs_scr[...] = jnp.zeros_like(hs_scr)

    def gather(t):
        tok = tok_ref[t]
        x_scr[pl.ds(t, 1), :] = jnp.maximum(emb_ref[pl.ds(tok, 1), :], 0.0)

    if T <= _UNROLL_MAX:
        for t in range(T):                   # static unroll: full LLO visibility
            gather(t)
    else:
        @pl.loop(0, T)
        def _(t):
            gather(t)

    # One batched (T_pad, H) @ (H, 4H) matmul for every x-side gate term; all
    # biases folded in here so the recurrence does a single add per step.
    gx_scr[...] = (jnp.dot(x_scr[...], wx_ref[...], preferred_element_type=jnp.float32)
                   + bg_ref[...])

    # ------------- serial recurrence: only h @ Wh + gate math -------------
    wh = wh_ref[...]                         # hoisted load, stays in vregs

    def step(t, h):                          # h: (1, H) f32
        g = gx_scr[pl.ds(t, 1), :] + jnp.dot(h, wh, preferred_element_type=jnp.float32)
        r = jax.nn.sigmoid(g[:, 0 * H:1 * H])
        z = jax.nn.sigmoid(g[:, 1 * H:2 * H])
        n = jnp.tanh(g[:, 2 * H:3 * H] + r * g[:, 3 * H:4 * H])
        h_new = (1.0 - z) * n + z * h
        hs_scr[pl.ds(t, 1), :] = h_new
        return h_new

    if T <= _UNROLL_MAX:
        h_fin = h0_ref[...]
        for t in range(T):
            h_fin = step(t, h_fin)
    else:
        h_fin = lax.fori_loop(0, T, step, h0_ref[...])

    hfin_ref[...] = h_fin                    # single write, after the loop

    # ------------- post-loop: batched output projection + log-softmax -------------
    logits = (jnp.dot(hs_scr[...], wo_ref[...], preferred_element_type=jnp.float32)
              + bo_ref[...])                 # (T_pad, OP); pad cols stay at -1e30
    m = jnp.max(logits, axis=-1, keepdims=True)
    shifted = logits - m
    lse = jnp.log(jnp.sum(jnp.exp(shifted), axis=-1, keepdims=True))
    logp_ref[...] = shifted - lse            # one dense (T_pad, 128) store


def prep_params(params):
    """One-time packing of PyTorch-layout parameters into kernel layout."""
    H = params["weight_ih"].shape[1]
    O = params["out_weight"].shape[0]
    OP = pl.cdiv(O, 128) * 128                             # lane-dense output width

    wih_t = params["weight_ih"].astype(jnp.float32).T      # (H, 3H) cols [ir|iz|in]
    whh_t = params["weight_hh"].astype(jnp.float32).T      # (H, 3H) cols [hr|hz|hn]

    wx = jnp.zeros((H, 4 * H), jnp.float32)
    wx = wx.at[:, 0:3 * H].set(wih_t)                      # [ir | iz | in | 0 ]
    wh = jnp.zeros((H, 4 * H), jnp.float32)
    wh = wh.at[:, 0:2 * H].set(whh_t[:, 0:2 * H])          # [hr | hz | .  | . ]
    wh = wh.at[:, 3 * H:4 * H].set(whh_t[:, 2 * H:3 * H])  # [ . | .  | 0  | hn]

    b_ih = params["bias_ih"].astype(jnp.float32)
    b_hh = params["bias_hh"].astype(jnp.float32)
    bg = jnp.concatenate([b_ih[:2 * H] + b_hh[:2 * H],     # combined r,z biases
                          b_ih[2 * H:],                    # b_in (inside tanh, no r scaling)
                          b_hh[2 * H:]])[None, :]          # b_hn (scaled by r)

    wo = jnp.zeros((H, OP), jnp.float32).at[:, :O].set(
        params["out_weight"].astype(jnp.float32).T)
    bo = jnp.full((1, OP), -1e30, jnp.float32).at[0, :O].set(
        params["out_bias"].astype(jnp.float32))

    return {"emb": params["embedding"].astype(jnp.float32),
            "wx": wx, "wh": wh, "bg": bg, "wo": wo, "bo": bo}


def decoder_rnn_decode(tokens, hidden, prepped):
    """Fused multi-step decode.

    tokens: (T,) int32 token ids, hidden: (1, 1, H) f32 initial hidden.
    Returns (log_probs (T, O), final hidden (1, 1, H)); row t equals the PyTorch
    module's single-step output when iterated token by token."""
    emb, wx, wh = prepped["emb"], prepped["wx"], prepped["wh"]
    bg, wo, bo = prepped["bg"], prepped["wo"], prepped["bo"]
    O, H = emb.shape
    OP = wo.shape[1]
    T = int(tokens.shape[0])
    T_pad = int(pl.cdiv(T, 8) * 8)                         # sublane-dense output rows

    tok = jnp.clip(jnp.asarray(tokens, jnp.int32).reshape(T), 0, O - 1)
    h0 = hidden.reshape(1, H).astype(jnp.float32)

    def const(shape):
        return pl.BlockSpec(shape, lambda i, tok_ref: tuple(0 for _ in shape))

    kernel = functools.partial(_decoder_kernel, T)

    logp_p, h_fin = pl.pallas_call(
        kernel,
        out_shape=(jax.ShapeDtypeStruct((T_pad, OP), jnp.float32),
                   jax.ShapeDtypeStruct((1, H), jnp.float32)),
        grid_spec=pltpu.PrefetchScalarGridSpec(
            num_scalar_prefetch=1,
            grid=(1,),                                     # whole decode in one invocation
            in_specs=[
                const((O, H)),          # embedding (resident, DMA'd once)
                const((1, H)),          # initial hidden
                const((H, 4 * H)),      # packed W_x
                const((H, 4 * H)),      # packed W_h
                const((1, 4 * H)),      # packed biases
                const((H, OP)),         # W_out^T (lane-padded)
                const((1, OP)),         # b_out   (lane-padded)
            ],
            out_specs=[
                const((T_pad, OP)),     # all log-prob rows, single dense block
                const((1, H)),          # final hidden
            ],
            scratch_shapes=[
                pltpu.VMEM((T_pad, H), jnp.float32),       # relu(emb[tok])
                pltpu.VMEM((T_pad, 4 * H), jnp.float32),   # x-side gate pre-activations
                pltpu.VMEM((T_pad, H), jnp.float32),       # all hidden states
            ],
        ),
        compiler_params=pltpu.CompilerParams(
            dimension_semantics=("arbitrary",),
        ),
    )(tok, emb, h0, wx, wh, bg, wo, bo)

    return logp_p[:T, :O], h_fin.reshape(1, 1, H)


def decoder_rnn_step(token, hidden, prepped):
    """Single-step API matching the PyTorch module: returns ((1, O), (1, 1, H))."""
    tokens = jnp.asarray(token, jnp.int32).reshape(1)
    logp, h_new = decoder_rnn_decode(tokens, hidden, prepped)
    return logp, h_new


def init_params(key, hidden_size, output_size):
    ks = jax.random.split(key, 7)
    s = 1.0 / jnp.sqrt(hidden_size)
    return {
        "embedding":  jax.random.normal(ks[0], (output_size, hidden_size), jnp.float32),
        "weight_ih":  jax.random.uniform(ks[1], (3 * hidden_size, hidden_size), jnp.float32, -s, s),
        "weight_hh":  jax.random.uniform(ks[2], (3 * hidden_size, hidden_size), jnp.float32, -s, s),
        "bias_ih":    jax.random.uniform(ks[3], (3 * hidden_size,), jnp.float32, -s, s),
        "bias_hh":    jax.random.uniform(ks[4], (3 * hidden_size,), jnp.float32, -s, s),
        "out_weight": jax.random.uniform(ks[5], (output_size, hidden_size), jnp.float32, -s, s),
        "out_bias":   jax.random.uniform(ks[6], (output_size,), jnp.float32, -s, s),
    }


def reference_step(token, hidden, p):
    H = hidden.shape[-1]
    x = jnp.maximum(p["embedding"][token], 0.0).reshape(1, H)
    h = hidden.reshape(1, H)
    gi = x @ p["weight_ih"].T + p["bias_ih"]
    gh = h @ p["weight_hh"].T + p["bias_hh"]
    r = jax.nn.sigmoid(gi[:, :H] + gh[:, :H])
    z = jax.nn.sigmoid(gi[:, H:2 * H] + gh[:, H:2 * H])
    n = jnp.tanh(gi[:, 2 * H:] + r * gh[:, 2 * H:])
    h_new = (1.0 - z) * n + z * h
    logits = h_new @ p["out_weight"].T + p["out_bias"]
    return jax.nn.log_softmax(logits, axis=1), h_new.reshape(1, 1, H)


def reference_decode(tokens, hidden, p):
    outs = []
    h = hidden
    for t in range(tokens.shape[0]):
        logp, h = reference_step(int(tokens[t]), h, p)
        outs.append(logp)
    return jnp.concatenate(outs, axis=0), h


if __name__ == "__main__":
    key = jax.random.PRNGKey(0)
    params = init_params(key, HIDDEN, OUTPUT)
    prepped = prep_params(params)

    hidden = jnp.zeros((1, 1, HIDDEN), jnp.float32)            # initHidden()

    # Fused multi-step decode, T a multiple of 8.
    T = 8
    tokens = jax.random.randint(jax.random.PRNGKey(1), (T,), 0, OUTPUT, dtype=jnp.int32)
    logp_seq, h_final = decoder_rnn_decode(tokens, hidden, prepped)
    jax.block_until_ready((logp_seq, h_final))
    ref_seq, ref_h = reference_decode(tokens, hidden, params)
    assert logp_seq.shape == (T, OUTPUT) and h_final.shape == (1, 1, HIDDEN)
    assert jnp.allclose(logp_seq, ref_seq, atol=1e-5), "fused log-softmax outputs mismatch"
    assert jnp.allclose(h_final, ref_h, atol=1e-5), "fused final hidden mismatch"

    # Fused decode with T not a multiple of 8 (exercises row padding).
    T2 = 5
    tokens2 = jax.random.randint(jax.random.PRNGKey(2), (T2,), 0, OUTPUT, dtype=jnp.int32)
    logp2, h2 = decoder_rnn_decode(tokens2, hidden, prepped)
    jax.block_until_ready((logp2, h2))
    ref2, ref_h2 = reference_decode(tokens2, hidden, params)
    assert logp2.shape == (T2, OUTPUT)
    assert jnp.allclose(logp2, ref2, atol=1e-5), "padded-T log-softmax mismatch"
    assert jnp.allclose(h2, ref_h2, atol=1e-5), "padded-T final hidden mismatch"

    # Single-step API matching the PyTorch module signature.
    logp1, h1 = decoder_rnn_step(tokens[0], hidden, prepped)
    jax.block_until_ready((logp1, h1))
    ref_logp1, ref_h1 = reference_step(int(tokens[0]), hidden, params)
    assert logp1.shape == (1, OUTPUT) and h1.shape == (1, 1, HIDDEN)
    assert jnp.allclose(logp1, ref_logp1, atol=1e-5), "single-step log-softmax mismatch"
    assert jnp.allclose(h1, ref_h1, atol=1e-5), "single-step hidden mismatch"

    print("KERNEL_OK")
</pallas_src>

<mosaic_0001>
module attributes {stable_mosaic.version = 11 : i64} {
  func.func @_decoder_kernel(%arg0: i32, %arg1: memref<8xi32, #tpu.memory_space<smem>>, %arg2: memref<64x32xf32, #tpu.memory_space<vmem>>, %arg3: memref<1x32xf32, #tpu.memory_space<vmem>>, %arg4: memref<32x128xf32, #tpu.memory_space<vmem>>, %arg5: memref<32x128xf32, #tpu.memory_space<vmem>>, %arg6: memref<1x128xf32, #tpu.memory_space<vmem>>, %arg7: memref<32x128xf32, #tpu.memory_space<vmem>>, %arg8: memref<1x128xf32, #tpu.memory_space<vmem>>, %arg9: memref<8x128xf32, #tpu.memory_space<vmem>>, %arg10: memref<1x32xf32, #tpu.memory_space<vmem>>, %arg11: memref<8x32xf32, #tpu.memory_space<vmem>>, %arg12: memref<8x128xf32, #tpu.memory_space<vmem>>, %arg13: memref<8x32xf32, #tpu.memory_space<vmem>>) attributes {dimension_semantics = [#tpu.dimension_semantics<arbitrary>], iteration_bounds = array<i64: 1>, scalar_prefetch = 1 : i64, scratch_operands = 3 : i64, tpu.core_type = #tpu.core_type<tc>, window_params = [{pipeline_mode = #tpu.pipeline_mode<synchronous>, transform_indices = @transform_0, window_bounds = array<i64: 64, 32>}, {pipeline_mode = #tpu.pipeline_mode<synchronous>, transform_indices = @transform_1, window_bounds = array<i64: 1, 32>}, {pipeline_mode = #tpu.pipeline_mode<synchronous>, transform_indices = @transform_2, window_bounds = array<i64: 32, 128>}, {pipeline_mode = #tpu.pipeline_mode<synchronous>, transform_indices = @transform_3, window_bounds = array<i64: 32, 128>}, {pipeline_mode = #tpu.pipeline_mode<synchronous>, transform_indices = @transform_4, window_bounds = array<i64: 1, 128>}, {pipeline_mode = #tpu.pipeline_mode<synchronous>, transform_indices = @transform_5, window_bounds = array<i64: 32, 128>}, {pipeline_mode = #tpu.pipeline_mode<synchronous>, transform_indices = @transform_6, window_bounds = array<i64: 1, 128>}, {pipeline_mode = #tpu.pipeline_mode<synchronous>, transform_indices = @transform_7, window_bounds = array<i64: 8, 128>}, {pipeline_mode = #tpu.pipeline_mode<synchronous>, transform_indices = @transform_8, window_bounds = array<i64: 1, 32>}]} {
    %c0 = arith.constant 0 : index
    %0 = memref.load %arg1[%c0] : memref<8xi32, #tpu.memory_space<smem>>
    %1 = arith.index_cast %0 : i32 to index
    %c0_0 = arith.constant 0 : index
    %2 = vector.load %arg2[%1, %c0_0] : memref<64x32xf32, #tpu.memory_space<vmem>>, vector<1x32xf32>
    %cst = arith.constant 0.000000e+00 : f32
    %3 = vector.broadcast %cst : f32 to vector<1x32xf32>
    %4 = arith.maximumf %2, %3 : vector<1x32xf32>
    %c0_1 = arith.constant 0 : index
    %c0_2 = arith.constant 0 : index
    %5 = vector.load %arg11[%c0_1, %c0_2] : memref<8x32xf32, #tpu.memory_space<vmem>>, vector<1x32xf32>
    tpu.vector_store %arg11[%c0_1, %c0_2], %4 {strides = array<i32>} : memref<8x32xf32, #tpu.memory_space<vmem>>, vector<1x32xf32>,
    %c1 = arith.constant 1 : index
    %6 = memref.load %arg1[%c1] : memref<8xi32, #tpu.memory_space<smem>>
    %7 = arith.index_cast %6 : i32 to index
    %c0_3 = arith.constant 0 : index
    %8 = vector.load %arg2[%7, %c0_3] : memref<64x32xf32, #tpu.memory_space<vmem>>, vector<1x32xf32>
    %cst_4 = arith.constant 0.000000e+00 : f32
    %9 = vector.broadcast %cst_4 : f32 to vector<1x32xf32>
    %10 = arith.maximumf %8, %9 : vector<1x32xf32>
    %c1_5 = arith.constant 1 : index
    %c0_6 = arith.constant 0 : index
    %11 = vector.load %arg11[%c1_5, %c0_6] : memref<8x32xf32, #tpu.memory_space<vmem>>, vector<1x32xf32>
    tpu.vector_store %arg11[%c1_5, %c0_6], %10 {strides = array<i32>} : memref<8x32xf32, #tpu.memory_space<vmem>>, vector<1x32xf32>,
    %c2 = arith.constant 2 : index
    %12 = memref.load %arg1[%c2] : memref<8xi32, #tpu.memory_space<smem>>
    %13 = arith.index_cast %12 : i32 to index
    %c0_7 = arith.constant 0 : index
    %14 = vector.load %arg2[%13, %c0_7] : memref<64x32xf32, #tpu.memory_space<vmem>>, vector<1x32xf32>
    %cst_8 = arith.constant 0.000000e+00 : f32
    %15 = vector.broadcast %cst_8 : f32 to vector<1x32xf32>
    %16 = arith.maximumf %14, %15 : vector<1x32xf32>
    %c2_9 = arith.constant 2 : index
    %c0_10 = arith.constant 0 : index
    %17 = vector.load %arg11[%c2_9, %c0_10] : memref<8x32xf32, #tpu.memory_space<vmem>>, vector<1x32xf32>
    tpu.vector_store %arg11[%c2_9, %c0_10], %16 {strides = array<i32>} : memref<8x32xf32, #tpu.memory_space<vmem>>, vector<1x32xf32>,
    %c3 = arith.constant 3 : index
    %18 = memref.load %arg1[%c3] : memref<8xi32, #tpu.memory_space<smem>>
    %19 = arith.index_cast %18 : i32 to index
    %c0_11 = arith.constant 0 : index
    %20 = vector.load %arg2[%19, %c0_11] : memref<64x32xf32, #tpu.memory_space<vmem>>, vector<1x32xf32>
    %cst_12 = arith.constant 0.000000e+00 : f32
    %21 = vector.broadcast %cst_12 : f32 to vector<1x32xf32>
    %22 = arith.maximumf %20, %21 : vector<1x32xf32>
    %c3_13 = arith.constant 3 : index
    %c0_14 = arith.constant 0 : index
    %23 = vector.load %arg11[%c3_13, %c0_14] : memref<8x32xf32, #tpu.memory_space<vmem>>, vector<1x32xf32>
    tpu.vector_store %arg11[%c3_13, %c0_14], %22 {strides = array<i32>} : memref<8x32xf32, #tpu.memory_space<vmem>>, vector<1x32xf32>,
    %c4 = arith.constant 4 : index
    %24 = memref.load %arg1[%c4] : memref<8xi32, #tpu.memory_space<smem>>
    %25 = arith.index_cast %24 : i32 to index
    %c0_15 = arith.constant 0 : index
    %26 = vector.load %arg2[%25, %c0_15] : memref<64x32xf32, #tpu.memory_space<vmem>>, vector<1x32xf32>
    %cst_16 = arith.constant 0.000000e+00 : f32
    %27 = vector.broadcast %cst_16 : f32 to vector<1x32xf32>
    %28 = arith.maximumf %26, %27 : vector<1x32xf32>
    %c4_17 = arith.constant 4 : index
    %c0_18 = arith.constant 0 : index
    %29 = vector.load %arg11[%c4_17, %c0_18] : memref<8x32xf32, #tpu.memory_space<vmem>>, vector<1x32xf32>
    tpu.vector_store %arg11[%c4_17, %c0_18], %28 {strides = array<i32>} : memref<8x32xf32, #tpu.memory_space<vmem>>, vector<1x32xf32>,
    %c5 = arith.constant 5 : index
    %30 = memref.load %arg1[%c5] : memref<8xi32, #tpu.memory_space<smem>>
    %31 = arith.index_cast %30 : i32 to index
    %c0_19 = arith.constant 0 : index
    %32 = vector.load %arg2[%31, %c0_19] : memref<64x32xf32, #tpu.memory_space<vmem>>, vector<1x32xf32>
    %cst_20 = arith.constant 0.000000e+00 : f32
    %33 = vector.broadcast %cst_20 : f32 to vector<1x32xf32>
    %34 = arith.maximumf %32, %33 : vector<1x32xf32>
    %c5_21 = arith.constant 5 : index
    %c0_22 = arith.constant 0 : index
    %35 = vector.load %arg11[%c5_21, %c0_22] : memref<8x32xf32, #tpu.memory_space<vmem>>, vector<1x32xf32>
    tpu.vector_store %arg11[%c5_21, %c0_22], %34 {strides = array<i32>} : memref<8x32xf32, #tpu.memory_space<vmem>>, vector<1x32xf32>,
    %c6 = arith.constant 6 : index
    %36 = memref.load %arg1[%c6] : memref<8xi32, #tpu.memory_space<smem>>
    %37 = arith.index_cast %36 : i32 to index
    %c0_23 = arith.constant 0 : index
    %38 = vector.load %arg2[%37, %c0_23] : memref<64x32xf32, #tpu.memory_space<vmem>>, vector<1x32xf32>
    %cst_24 = arith.constant 0.000000e+00 : f32
    %39 = vector.broadcast %cst_24 : f32 to vector<1x32xf32>
    %40 = arith.maximumf %38, %39 : vector<1x32xf32>
    %c6_25 = arith.constant 6 : index
    %c0_26 = arith.constant 0 : index
    %41 = vector.load %arg11[%c6_25, %c0_26] : memref<8x32xf32, #tpu.memory_space<vmem>>, vector<1x32xf32>
    tpu.vector_store %arg11[%c6_25, %c0_26], %40 {strides = array<i32>} : memref<8x32xf32, #tpu.memory_space<vmem>>, vector<1x32xf32>,
    %c7 = arith.constant 7 : index
    %42 = memref.load %arg1[%c7] : memref<8xi32, #tpu.memory_space<smem>>
    %43 = arith.index_cast %42 : i32 to index
    %c0_27 = arith.constant 0 : index
    %44 = vector.load %arg2[%43, %c0_27] : memref<64x32xf32, #tpu.memory_space<vmem>>, vector<1x32xf32>
    %cst_28 = arith.constant 0.000000e+00 : f32
    %45 = vector.broadcast %cst_28 : f32 to vector<1x32xf32>
    %46 = arith.maximumf %44, %45 : vector<1x32xf32>
    %c7_29 = arith.constant 7 : index
    %c0_30 = arith.constant 0 : index
    %47 = vector.load %arg11[%c7_29, %c0_30] : memref<8x32xf32, #tpu.memory_space<vmem>>, vector<1x32xf32>
    tpu.vector_store %arg11[%c7_29, %c0_30], %46 {strides = array<i32>} : memref<8x32xf32, #tpu.memory_space<vmem>>, vector<1x32xf32>,
    %c0_31 = arith.constant 0 : index
    %c0_32 = arith.constant 0 : index
    %48 = vector.load %arg11[%c0_31, %c0_32] : memref<8x32xf32, #tpu.memory_space<vmem>>, vector<8x32xf32>
    %c0_33 = arith.constant 0 : index
    %c0_34 = arith.constant 0 : index
    %49 = vector.load %arg4[%c0_33, %c0_34] : memref<32x128xf32, #tpu.memory_space<vmem>>, vector<32x128xf32>
    %cst_35 = arith.constant dense<0.000000e+00> : vector<8x128xf32>
    %50 = tpu.matmul %48, %49, %cst_35 {dimension_numbers = #tpu.dot_dimension_numbers<[1], [0], [0], [1], [0, 0, 1, 1], [], []>} : vector<8x32xf32>, vector<32x128xf32>, vector<8x128xf32> -> vector<8x128xf32>
    %c0_36 = arith.constant 0 : index
    %c0_37 = arith.constant 0 : index
    %51 = vector.load %arg6[%c0_36, %c0_37] : memref<1x128xf32, #tpu.memory_space<vmem>>, vector<1x128xf32>
    %52 = vector.broadcast %51 : vector<1x128xf32> to vector<8x128xf32>
    %53 = arith.addf %50, %52 : vector<8x128xf32>
    %c0_38 = arith.constant 0 : index
    %c0_39 = arith.constant 0 : index
    %54 = vector.load %arg12[%c0_38, %c0_39] : memref<8x128xf32, #tpu.memory_space<vmem>>, vector<8x128xf32>
    tpu.vector_store %arg12[%c0_38, %c0_39], %53 {strides = array<i32>} : memref<8x128xf32, #tpu.memory_space<vmem>>, vector<8x128xf32>,
    %c0_40 = arith.constant 0 : index
    %c0_41 = arith.constant 0 : index
    %55 = vector.load %arg5[%c0_40, %c0_41] : memref<32x128xf32, #tpu.memory_space<vmem>>, vector<32x128xf32>
    %c0_42 = arith.constant 0 : index
    %c0_43 = arith.constant 0 : index
    %56 = vector.load %arg3[%c0_42, %c0_43] : memref<1x32xf32, #tpu.memory_space<vmem>>, vector<1x32xf32>
    %c0_44 = arith.constant 0 : index
    %c0_45 = arith.constant 0 : index
    %57 = vector.load %arg12[%c0_44, %c0_45] : memref<8x128xf32, #tpu.memory_space<vmem>>, vector<1x128xf32>
    %cst_46 = arith.constant dense<0.000000e+00> : vector<1x128xf32>
    %58 = tpu.matmul %56, %55, %cst_46 {dimension_numbers = #tpu.dot_dimension_numbers<[1], [0], [0], [1], [0, 0, 1, 1], [], []>} : vector<1x32xf32>, vector<32x128xf32>, vector<1x128xf32> -> vector<1x128xf32>
    %59 = arith.addf %57, %58 : vector<1x128xf32>
    %60 = vector.extract_strided_slice %59 {offsets = [0, 0], sizes = [1, 32], strides = [1, 1]} : vector<1x128xf32> to vector<1x32xf32>
    %61 = arith.negf %60 : vector<1x32xf32>
    %62 = math.exp %61 : vector<1x32xf32>
    %cst_47 = arith.constant 1.000000e+00 : f32
    %63 = vector.broadcast %cst_47 : f32 to vector<1x32xf32>
    %64 = arith.addf %63, %62 : vector<1x32xf32>
    %65 = arith.divf %63, %64 : vector<1x32xf32>
    %66 = vector.extract_strided_slice %59 {offsets = [0, 32], sizes = [1, 32], strides = [1, 1]} : vector<1x128xf32> to vector<1x32xf32>
    %67 = arith.negf %66 : vector<1x32xf32>
    %68 = math.exp %67 : vector<1x32xf32>
    %cst_48 = arith.constant 1.000000e+00 : f32
    %69 = vector.broadcast %cst_48 : f32 to vector<1x32xf32>
    %70 = arith.addf %69, %68 : vector<1x32xf32>
    %71 = arith.divf %69, %70 : vector<1x32xf32>
    %72 = vector.extract_strided_slice %59 {offsets = [0, 64], sizes = [1, 32], strides = [1, 1]} : vector<1x128xf32> to vector<1x32xf32>
    %73 = vector.extract_strided_slice %59 {offsets = [0, 96], sizes = [1, 32], strides = [1, 1]} : vector<1x128xf32> to vector<1x32xf32>
    %74 = arith.mulf %65, %73 : vector<1x32xf32>
    %75 = arith.addf %72, %74 : vector<1x32xf32>
    %76 = math.tanh %75 : vector<1x32xf32>
    %cst_49 = arith.constant 1.000000e+00 : f32
    %77 = vector.broadcast %cst_49 : f32 to vector<1x32xf32>
    %78 = arith.subf %77, %71 : vector<1x32xf32>
    %79 = arith.mulf %78, %76 : vector<1x32xf32>
    %80 = arith.mulf %71, %56 : vector<1x32xf32>
    %81 = arith.addf %79, %80 : vector<1x32xf32>
    %c0_50 = arith.constant 0 : index
    %c0_51 = arith.constant 0 : index
    %82 = vector.load %arg13[%c0_50, %c0_51] : memref<8x32xf32, #tpu.memory_space<vmem>>, vector<1x32xf32>
    tpu.vector_store %arg13[%c0_50, %c0_51], %81 {strides = array<i32>} : memref<8x32xf32, #tpu.memory_space<vmem>>, vector<1x32xf32>,
    %c1_52 = arith.constant 1 : index
    %c0_53 = arith.constant 0 : index
    %83 = vector.load %arg12[%c1_52, %c0_53] : memref<8x128xf32, #tpu.memory_space<vmem>>, vector<1x128xf32>
    %cst_54 = arith.constant dense<0.000000e+00> : vector<1x128xf32>
    %84 = tpu.matmul %81, %55, %cst_54 {dimension_numbers = #tpu.dot_dimension_numbers<[1], [0], [0], [1], [0, 0, 1, 1], [], []>} : vector<1x32xf32>, vector<32x128xf32>, vector<1x128xf32> -> vector<1x128xf32>
    %85 = arith.addf %83, %84 : vector<1x128xf32>
    %86 = vector.extract_strided_slice %85 {offsets = [0, 0], sizes = [1, 32], strides = [1, 1]} : vector<1x128xf32> to vector<1x32xf32>
    %87 = arith.negf %86 : vector<1x32xf32>
    %88 = math.exp %87 : vector<1x32xf32>
    %cst_55 = arith.constant 1.000000e+00 : f32
    %89 = vector.broadcast %cst_55 : f32 to vector<1x32xf32>
    %90 = arith.addf %89, %88 : vector<1x32xf32>
    %91 = arith.divf %89, %90 : vector<1x32xf32>
    %92 = vector.extract_strided_slice %85 {offsets = [0, 32], sizes = [1, 32], strides = [1, 1]} : vector<1x128xf32> to vector<1x32xf32>
    %93 = arith.negf %92 : vector<1x32xf32>
    %94 = math.exp %93 : vector<1x32xf32>
    %cst_56 = arith.constant 1.000000e+00 : f32
    %95 = vector.broadcast %cst_56 : f32 to vector<1x32xf32>
    %96 = arith.addf %95, %94 : vector<1x32xf32>
    %97 = arith.divf %95, %96 : vector<1x32xf32>
    %98 = vector.extract_strided_slice %85 {offsets = [0, 64], sizes = [1, 32], strides = [1, 1]} : vector<1x128xf32> to vector<1x32xf32>
    %99 = vector.extract_strided_slice %85 {offsets = [0, 96], sizes = [1, 32], strides = [1, 1]} : vector<1x128xf32> to vector<1x32xf32>
    %100 = arith.mulf %91, %99 : vector<1x32xf32>
    %101 = arith.addf %98, %100 : vector<1x32xf32>
    %102 = math.tanh %101 : vector<1x32xf32>
    %cst_57 = arith.constant 1.000000e+00 : f32
    %103 = vector.broadcast %cst_57 : f32 to vector<1x32xf32>
    %104 = arith.subf %103, %97 : vector<1x32xf32>
    %105 = arith.mulf %104, %102 : vector<1x32xf32>
    %106 = arith.mulf %97, %81 : vector<1x32xf32>
    %107 = arith.addf %105, %106 : vector<1x32xf32>
    %c1_58 = arith.constant 1 : index
    %c0_59 = arith.constant 0 : index
    %108 = vector.load %arg13[%c1_58, %c0_59] : memref<8x32xf32, #tpu.memory_space<vmem>>, vector<1x32xf32>
    tpu.vector_store %arg13[%c1_58, %c0_59], %107 {strides = array<i32>} : memref<8x32xf32, #tpu.memory_space<vmem>>, vector<1x32xf32>,
    %c2_60 = arith.constant 2 : index
    %c0_61 = arith.constant 0 : index
    %109 = vector.load %arg12[%c2_60, %c0_61] : memref<8x128xf32, #tpu.memory_space<vmem>>, vector<1x128xf32>
    %cst_62 = arith.constant dense<0.000000e+00> : vector<1x128xf32>
    %110 = tpu.matmul %107, %55, %cst_62 {dimension_numbers = #tpu.dot_dimension_numbers<[1], [0], [0], [1], [0, 0, 1, 1], [], []>} : vector<1x32xf32>, vector<32x128xf32>, vector<1x128xf32> -> vector<1x128xf32>
    %111 = arith.addf %109, %110 : vector<1x128xf32>
    %112 = vector.extract_strided_slice %111 {offsets = [0, 0], sizes = [1, 32], strides = [1, 1]} : vector<1x128xf32> to vector<1x32xf32>
    %113 = arith.negf %112 : vector<1x32xf32>
    %114 = math.exp %113 : vector<1x32xf32>
    %cst_63 = arith.constant 1.000000e+00 : f32
    %115 = vector.broadcast %cst_63 : f32 to vector<1x32xf32>
    %116 = arith.addf %115, %114 : vector<1x32xf32>
    %117 = arith.divf %115, %116 : vector<1x32xf32>
    %118 = vector.extract_strided_slice %111 {offsets = [0, 32], sizes = [1, 32], strides = [1, 1]} : vector<1x128xf32> to vector<1x32xf32>
    %119 = arith.negf %118 : vector<1x32xf32>
    %120 = math.exp %119 : vector<1x32xf32>
    %cst_64 = arith.constant 1.000000e+00 : f32
    %121 = vector.broadcast %cst_64 : f32 to vector<1x32xf32>
    %122 = arith.addf %121, %120 : vector<1x32xf32>
    %123 = arith.divf %121, %122 : vector<1x32xf32>
    %124 = vector.extract_strided_slice %111 {offsets = [0, 64], sizes = [1, 32], strides = [1, 1]} : vector<1x128xf32> to vector<1x32xf32>
    %125 = vector.extract_strided_slice %111 {offsets = [0, 96], sizes = [1, 32], strides = [1, 1]} : vector<1x128xf32> to vector<1x32xf32>
    %126 = arith.mulf %117, %125 : vector<1x32xf32>
    %127 = arith.addf %124, %126 : vector<1x32xf32>
    %128 = math.tanh %127 : vector<1x32xf32>
    %cst_65 = arith.constant 1.000000e+00 : f32
    %129 = vector.broadcast %cst_65 : f32 to vector<1x32xf32>
    %130 = arith.subf %129, %123 : vector<1x32xf32>
    %131 = arith.mulf %130, %128 : vector<1x32xf32>
    %132 = arith.mulf %123, %107 : vector<1x32xf32>
    %133 = arith.addf %131, %132 : vector<1x32xf32>
    %c2_66 = arith.constant 2 : index
    %c0_67 = arith.constant 0 : index
    %134 = vector.load %arg13[%c2_66, %c0_67] : memref<8x32xf32, #tpu.memory_space<vmem>>, vector<1x32xf32>
    tpu.vector_store %arg13[%c2_66, %c0_67], %133 {strides = array<i32>} : memref<8x32xf32, #tpu.memory_space<vmem>>, vector<1x32xf32>,
    %c3_68 = arith.constant 3 : index
    %c0_69 = arith.constant 0 : index
    %135 = vector.load %arg12[%c3_68, %c0_69] : memref<8x128xf32, #tpu.memory_space<vmem>>, vector<1x128xf32>
    %cst_70 = arith.constant dense<0.000000e+00> : vector<1x128xf32>
    %136 = tpu.matmul %133, %55, %cst_70 {dimension_numbers = #tpu.dot_dimension_numbers<[1], [0], [0], [1], [0, 0, 1, 1], [], []>} : vector<1x32xf32>, vector<32x128xf32>, vector<1x128xf32> -> vector<1x128xf32>
    %137 = arith.addf %135, %136 : vector<1x128xf32>
    %138 = vector.extract_strided_slice %137 {offsets = [0, 0], sizes = [1, 32], strides = [1, 1]} : vector<1x128xf32> to vector<1x32xf32>
    %139 = arith.negf %138 : vector<1x32xf32>
    %140 = math.exp %139 : vector<1x32xf32>
    %cst_71 = arith.constant 1.000000e+00 : f32
    %141 = vector.broadcast %cst_71 : f32 to vector<1x32xf32>
    %142 = arith.addf %141, %140 : vector<1x32xf32>
    %143 = arith.divf %141, %142 : vector<1x32xf32>
    %144 = vector.extract_strided_slice %137 {offsets = [0, 32], sizes = [1, 32], strides = [1, 1]} : vector<1x128xf32> to vector<1x32xf32>
    %145 = arith.negf %144 : vector<1x32xf32>
    %146 = math.exp %145 : vector<1x32xf32>
    %cst_72 = arith.constant 1.000000e+00 : f32
    %147 = vector.broadcast %cst_72 : f32 to vector<1x32xf32>
    %148 = arith.addf %147, %146 : vector<1x32xf32>
    %149 = arith.divf %147, %148 : vector<1x32xf32>
    %150 = vector.extract_strided_slice %137 {offsets = [0, 64], sizes = [1, 32], strides = [1, 1]} : vector<1x128xf32> to vector<1x32xf32>
    %151 = vector.extract_strided_slice %137 {offsets = [0, 96], sizes = [1, 32], strides = [1, 1]} : vector<1x128xf32> to vector<1x32xf32>
    %152 = arith.mulf %143, %151 : vector<1x32xf32>
    %153 = arith.addf %150, %152 : vector<1x32xf32>
    %154 = math.tanh %153 : vector<1x32xf32>
    %cst_73 = arith.constant 1.000000e+00 : f32
    %155 = vector.broadcast %cst_73 : f32 to vector<1x32xf32>
    %156 = arith.subf %155, %149 : vector<1x32xf32>
    %157 = arith.mulf %156, %154 : vector<1x32xf32>
    %158 = arith.mulf %149, %133 : vector<1x32xf32>
    %159 = arith.addf %157, %158 : vector<1x32xf32>
    %c3_74 = arith.constant 3 : index
    %c0_75 = arith.constant 0 : index
    %160 = vector.load %arg13[%c3_74, %c0_75] : memref<8x32xf32, #tpu.memory_space<vmem>>, vector<1x32xf32>
    tpu.vector_store %arg13[%c3_74, %c0_75], %159 {strides = array<i32>} : memref<8x32xf32, #tpu.memory_space<vmem>>, vector<1x32xf32>,
    %c4_76 = arith.constant 4 : index
    %c0_77 = arith.constant 0 : index
    %161 = vector.load %arg12[%c4_76, %c0_77] : memref<8x128xf32, #tpu.memory_space<vmem>>, vector<1x128xf32>
    %cst_78 = arith.constant dense<0.000000e+00> : vector<1x128xf32>
    %162 = tpu.matmul %159, %55, %cst_78 {dimension_numbers = #tpu.dot_dimension_numbers<[1], [0], [0], [1], [0, 0, 1, 1], [], []>} : vector<1x32xf32>, vector<32x128xf32>, vector<1x128xf32> -> vector<1x128xf32>
    %163 = arith.addf %161, %162 : vector<1x128xf32>
    %164 = vector.extract_strided_slice %163 {offsets = [0, 0], sizes = [1, 32], strides = [1, 1]} : vector<1x128xf32> to vector<1x32xf32>
    %165 = arith.negf %164 : vector<1x32xf32>
    %166 = math.exp %165 : vector<1x32xf32>
    %cst_79 = arith.constant 1.000000e+00 : f32
    %167 = vector.broadcast %cst_79 : f32 to vector<1x32xf32>
    %168 = arith.addf %167, %166 : vector<1x32xf32>
    %169 = arith.divf %167, %168 : vector<1x32xf32>
    %170 = vector.extract_strided_slice %163 {offsets = [0, 32], sizes = [1, 32], strides = [1, 1]} : vector<1x128xf32> to vector<1x32xf32>
    %171 = arith.negf %170 : vector<1x32xf32>
    %172 = math.exp %171 : vector<1x32xf32>
    %cst_80 = arith.constant 1.000000e+00 : f32
    %173 = vector.broadcast %cst_80 : f32 to vector<1x32xf32>
    %174 = arith.addf %173, %172 : vector<1x32xf32>
    %175 = arith.divf %173, %174 : vector<1x32xf32>
    %176 = vector.extract_strided_slice %163 {offsets = [0, 64], sizes = [1, 32], strides = [1, 1]} : vector<1x128xf32> to vector<1x32xf32>
    %177 = vector.extract_strided_slice %163 {offsets = [0, 96], sizes = [1, 32], strides = [1, 1]} : vector<1x128xf32> to vector<1x32xf32>
    %178 = arith.mulf %169, %177 : vector<1x32xf32>
    %179 = arith.addf %176, %178 : vector<1x32xf32>
    %180 = math.tanh %179 : vector<1x32xf32>
    %cst_81 = arith.constant 1.000000e+00 : f32
    %181 = vector.broadcast %cst_81 : f32 to vector<1x32xf32>
    %182 = arith.subf %181, %175 : vector<1x32xf32>
    %183 = arith.mulf %182, %180 : vector<1x32xf32>
    %184 = arith.mulf %175, %159 : vector<1x32xf32>
    %185 = arith.addf %183, %184 : vector<1x32xf32>
    %c4_82 = arith.constant 4 : index
    %c0_83 = arith.constant 0 : index
    %186 = vector.load %arg13[%c4_82, %c0_83] : memref<8x32xf32, #tpu.memory_space<vmem>>, vector<1x32xf32>
    tpu.vector_store %arg13[%c4_82, %c0_83], %185 {strides = array<i32>} : memref<8x32xf32, #tpu.memory_space<vmem>>, vector<1x32xf32>,
    %c5_84 = arith.constant 5 : index
    %c0_85 = arith.constant 0 : index
    %187 = vector.load %arg12[%c5_84, %c0_85] : memref<8x128xf32, #tpu.memory_space<vmem>>, vector<1x128xf32>
    %cst_86 = arith.constant dense<0.000000e+00> : vector<1x128xf32>
    %188 = tpu.matmul %185, %55, %cst_86 {dimension_numbers = #tpu.dot_dimension_numbers<[1], [0], [0], [1], [0, 0, 1, 1], [], []>} : vector<1x32xf32>, vector<32x128xf32>, vector<1x128xf32> -> vector<1x128xf32>
    %189 = arith.addf %187, %188 : vector<1x128xf32>
    %190 = vector.extract_strided_slice %189 {offsets = [0, 0], sizes = [1, 32], strides = [1, 1]} : vector<1x128xf32> to vector<1x32xf32>
    %191 = arith.negf %190 : vector<1x32xf32>
    %192 = math.exp %191 : vector<1x32xf32>
    %cst_87 = arith.constant 1.000000e+00 : f32
    %193 = vector.broadcast %cst_87 : f32 to vector<1x32xf32>
    %194 = arith.addf %193, %192 : vector<1x32xf32>
    %195 = arith.divf %193, %194 : vector<1x32xf32>
    %196 = vector.extract_strided_slice %189 {offsets = [0, 32], sizes = [1, 32], strides = [1, 1]} : vector<1x128xf32> to vector<1x32xf32>
    %197 = arith.negf %196 : vector<1x32xf32>
    %198 = math.exp %197 : vector<1x32xf32>
    %cst_88 = arith.constant 1.000000e+00 : f32
    %199 = vector.broadcast %cst_88 : f32 to vector<1x32xf32>
    %200 = arith.addf %199, %198 : vector<1x32xf32>
    %201 = arith.divf %199, %200 : vector<1x32xf32>
    %202 = vector.extract_strided_slice %189 {offsets = [0, 64], sizes = [1, 32], strides = [1, 1]} : vector<1x128xf32> to vector<1x32xf32>
    %203 = vector.extract_strided_slice %189 {offsets = [0, 96], sizes = [1, 32], strides = [1, 1]} : vector<1x128xf32> to vector<1x32xf32>
    %204 = arith.mulf %195, %203 : vector<1x32xf32>
    %205 = arith.addf %202, %204 : vector<1x32xf32>
    %206 = math.tanh %205 : vector<1x32xf32>
    %cst_89 = arith.constant 1.000000e+00 : f32
    %207 = vector.broadcast %cst_89 : f32 to vector<1x32xf32>
    %208 = arith.subf %207, %201 : vector<1x32xf32>
    %209 = arith.mulf %208, %206 : vector<1x32xf32>
    %210 = arith.mulf %201, %185 : vector<1x32xf32>
    %211 = arith.addf %209, %210 : vector<1x32xf32>
    %c5_90 = arith.constant 5 : index
    %c0_91 = arith.constant 0 : index
    %212 = vector.load %arg13[%c5_90, %c0_91] : memref<8x32xf32, #tpu.memory_space<vmem>>, vector<1x32xf32>
    tpu.vector_store %arg13[%c5_90, %c0_91], %211 {strides = array<i32>} : memref<8x32xf32, #tpu.memory_space<vmem>>, vector<1x32xf32>,
    %c6_92 = arith.constant 6 : index
    %c0_93 = arith.constant 0 : index
    %213 = vector.load %arg12[%c6_92, %c0_93] : memref<8x128xf32, #tpu.memory_space<vmem>>, vector<1x128xf32>
    %cst_94 = arith.constant dense<0.000000e+00> : vector<1x128xf32>
    %214 = tpu.matmul %211, %55, %cst_94 {dimension_numbers = #tpu.dot_dimension_numbers<[1], [0], [0], [1], [0, 0, 1, 1], [], []>} : vector<1x32xf32>, vector<32x128xf32>, vector<1x128xf32> -> vector<1x128xf32>
    %215 = arith.addf %213, %214 : vector<1x128xf32>
    %216 = vector.extract_strided_slice %215 {offsets = [0, 0], sizes = [1, 32], strides = [1, 1]} : vector<1x128xf32> to vector<1x32xf32>
    %217 = arith.negf %216 : vector<1x32xf32>
    %218 = math.exp %217 : vector<1x32xf32>
    %cst_95 = arith.constant 1.000000e+00 : f32
    %219 = vector.broadcast %cst_95 : f32 to vector<1x32xf32>
    %220 = arith.addf %219, %218 : vector<1x32xf32>
    %221 = arith.divf %219, %220 : vector<1x32xf32>
    %222 = vector.extract_strided_slice %215 {offsets = [0, 32], sizes = [1, 32], strides = [1, 1]} : vector<1x128xf32> to vector<1x32xf32>
    %223 = arith.negf %222 : vector<1x32xf32>
    %224 = math.exp %223 : vector<1x32xf32>
    %cst_96 = arith.constant 1.000000e+00 : f32
    %225 = vector.broadcast %cst_96 : f32 to vector<1x32xf32>
    %226 = arith.addf %225, %224 : vector<1x32xf32>
    %227 = arith.divf %225, %226 : vector<1x32xf32>
    %228 = vector.extract_strided_slice %215 {offsets = [0, 64], sizes = [1, 32], strides = [1, 1]} : vector<1x128xf32> to vector<1x32xf32>
    %229 = vector.extract_strided_slice %215 {offsets = [0, 96], sizes = [1, 32], strides = [1, 1]} : vector<1x128xf32> to vector<1x32xf32>
    %230 = arith.mulf %221, %229 : vector<1x32xf32>
    %231 = arith.addf %228, %230 : vector<1x32xf32>
    %232 = math.tanh %231 : vector<1x32xf32>
    %cst_97 = arith.constant 1.000000e+00 : f32
    %233 = vector.broadcast %cst_97 : f32 to vector<1x32xf32>
    %234 = arith.subf %233, %227 : vector<1x32xf32>
    %235 = arith.mulf %234, %232 : vector<1x32xf32>
    %236 = arith.mulf %227, %211 : vector<1x32xf32>
    %237 = arith.addf %235, %236 : vector<1x32xf32>
    %c6_98 = arith.constant 6 : index
    %c0_99 = arith.constant 0 : index
    %238 = vector.load %arg13[%c6_98, %c0_99] : memref<8x32xf32, #tpu.memory_space<vmem>>, vector<1x32xf32>
    tpu.vector_store %arg13[%c6_98, %c0_99], %237 {strides = array<i32>} : memref<8x32xf32, #tpu.memory_space<vmem>>, vector<1x32xf32>,
    %c7_100 = arith.constant 7 : index
    %c0_101 = arith.constant 0 : index
    %239 = vector.load %arg12[%c7_100, %c0_101] : memref<8x128xf32, #tpu.memory_space<vmem>>, vector<1x128xf32>
    %cst_102 = arith.constant dense<0.000000e+00> : vector<1x128xf32>
    %240 = tpu.matmul %237, %55, %cst_102 {dimension_numbers = #tpu.dot_dimension_numbers<[1], [0], [0], [1], [0, 0, 1, 1], [], []>} : vector<1x32xf32>, vector<32x128xf32>, vector<1x128xf32> -> vector<1x128xf32>
    %241 = arith.addf %239, %240 : vector<1x128xf32>
    %242 = vector.extract_strided_slice %241 {offsets = [0, 0], sizes = [1, 32], strides = [1, 1]} : vector<1x128xf32> to vector<1x32xf32>
    %243 = arith.negf %242 : vector<1x32xf32>
    %244 = math.exp %243 : vector<1x32xf32>
    %cst_103 = arith.constant 1.000000e+00 : f32
    %245 = vector.broadcast %cst_103 : f32 to vector<1x32xf32>
    %246 = arith.addf %245, %244 : vector<1x32xf32>
    %247 = arith.divf %245, %246 : vector<1x32xf32>
    %248 = vector.extract_strided_slice %241 {offsets = [0, 32], sizes = [1, 32], strides = [1, 1]} : vector<1x128xf32> to vector<1x32xf32>
    %249 = arith.negf %248 : vector<1x32xf32>
    %250 = math.exp %249 : vector<1x32xf32>
    %cst_104 = arith.constant 1.000000e+00 : f32
    %251 = vector.broadcast %cst_104 : f32 to vector<1x32xf32>
    %252 = arith.addf %251, %250 : vector<1x32xf32>
    %253 = arith.divf %251, %252 : vector<1x32xf32>
    %254 = vector.extract_strided_slice %241 {offsets = [0, 64], sizes = [1, 32], strides = [1, 1]} : vector<1x128xf32> to vector<1x32xf32>
    %255 = vector.extract_strided_slice %241 {offsets = [0, 96], sizes = [1, 32], strides = [1, 1]} : vector<1x128xf32> to vector<1x32xf32>
    %256 = arith.mulf %247, %255 : vector<1x32xf32>
    %257 = arith.addf %254, %256 : vector<1x32xf32>
    %258 = math.tanh %257 : vector<1x32xf32>
    %cst_105 = arith.constant 1.000000e+00 : f32
    %259 = vector.broadcast %cst_105 : f32 to vector<1x32xf32>
    %260 = arith.subf %259, %253 : vector<1x32xf32>
    %261 = arith.mulf %260, %258 : vector<1x32xf32>
    %262 = arith.mulf %253, %237 : vector<1x32xf32>
    %263 = arith.addf %261, %262 : vector<1x32xf32>
    %c7_106 = arith.constant 7 : index
    %c0_107 = arith.constant 0 : index
    %264 = vector.load %arg13[%c7_106, %c0_107] : memref<8x32xf32, #tpu.memory_space<vmem>>, vector<1x32xf32>
    tpu.vector_store %arg13[%c7_106, %c0_107], %263 {strides = array<i32>} : memref<8x32xf32, #tpu.memory_space<vmem>>, vector<1x32xf32>,
    %c0_108 = arith.constant 0 : index
    %c0_109 = arith.constant 0 : index
    %265 = vector.load %arg10[%c0_108, %c0_109] : memref<1x32xf32, #tpu.memory_space<vmem>>, vector<1x32xf32>
    tpu.vector_store %arg10[%c0_108, %c0_109], %263 {strides = array<i32>} : memref<1x32xf32, #tpu.memory_space<vmem>>, vector<1x32xf32>,
    %c0_110 = arith.constant 0 : index
    %c0_111 = arith.constant 0 : index
    %266 = vector.load %arg13[%c0_110, %c0_111] : memref<8x32xf32, #tpu.memory_space<vmem>>, vector<8x32xf32>
    %c0_112 = arith.constant 0 : index
    %c0_113 = arith.constant 0 : index
    %267 = vector.load %arg7[%c0_112, %c0_113] : memref<32x128xf32, #tpu.memory_space<vmem>>, vector<32x128xf32>
    %cst_114 = arith.constant dense<0.000000e+00> : vector<8x128xf32>
    %268 = tpu.matmul %266, %267, %cst_114 {dimension_numbers = #tpu.dot_dimension_numbers<[1], [0], [0], [1], [0, 0, 1, 1], [], []>} : vector<8x32xf32>, vector<32x128xf32>, vector<8x128xf32> -> vector<8x128xf32>
    %c0_115 = arith.constant 0 : index
    %c0_116 = arith.constant 0 : index
    %269 = vector.load %arg8[%c0_115, %c0_116] : memref<1x128xf32, #tpu.memory_space<vmem>>, vector<1x128xf32>
    %270 = vector.broadcast %269 : vector<1x128xf32> to vector<8x128xf32>
    %271 = arith.addf %268, %270 : vector<8x128xf32>
    %cst_117 = arith.constant dense<0xFF800000> : vector<8xf32>
    %272 = vector.multi_reduction <maximumf>, %271, %cst_117 [1] : vector<8x128xf32> to vector<8xf32>
    %273 = vector.shape_cast %272 : vector<8xf32> to vector<8x1xf32>
    %274 = vector.broadcast %273 : vector<8x1xf32> to vector<8x128xf32>
    %275 = arith.subf %271, %274 : vector<8x128xf32>
    %276 = math.exp %275 : vector<8x128xf32>
    %cst_118 = arith.constant dense<0.000000e+00> : vector<8xf32>
    %277 = vector.multi_reduction <add>, %276, %cst_118 [1] : vector<8x128xf32> to vector<8xf32>
    %278 = vector.shape_cast %277 : vector<8xf32> to vector<8x1xf32>
    %279 = math.log %278 : vector<8x1xf32>
    %280 = vector.broadcast %279 : vector<8x1xf32> to vector<8x128xf32>
    %281 = arith.subf %275, %280 : vector<8x128xf32>
    %c0_119 = arith.constant 0 : index
    %c0_120 = arith.constant 0 : index
    %282 = vector.load %arg9[%c0_119, %c0_120] : memref<8x128xf32, #tpu.memory_space<vmem>>, vector<8x128xf32>
    tpu.vector_store %arg9[%c0_119, %c0_120], %281 {strides = array<i32>} : memref<8x128xf32, #tpu.memory_space<vmem>>, vector<8x128xf32>,
    return
  }
  func.func @transform_0(%arg0: i32, %arg1: memref<8xi32, #tpu.memory_space<smem>>) -> (i32, i32) {
    %c0_i32 = arith.constant 0 : i32
    %c0_i32_0 = arith.constant 0 : i32
    %c0_i32_1 = arith.constant 0 : i32
    return %c0_i32, %c0_i32_0 : i32, i32
  }
  func.func @transform_1(%arg0: i32, %arg1: memref<8xi32, #tpu.memory_space<smem>>) -> (i32, i32) {
    %c0_i32 = arith.constant 0 : i32
    %c0_i32_0 = arith.constant 0 : i32
    %c0_i32_1 = arith.constant 0 : i32
    return %c0_i32, %c0_i32_0 : i32, i32
  }
  func.func @transform_2(%arg0: i32, %arg1: memref<8xi32, #tpu.memory_space<smem>>) -> (i32, i32) {
    %c0_i32 = arith.constant 0 : i32
    %c0_i32_0 = arith.constant 0 : i32
    %c0_i32_1 = arith.constant 0 : i32
    return %c0_i32, %c0_i32_0 : i32, i32
  }
  func.func @transform_3(%arg0: i32, %arg1: memref<8xi32, #tpu.memory_space<smem>>) -> (i32, i32) {
    %c0_i32 = arith.constant 0 : i32
    %c0_i32_0 = arith.constant 0 : i32
    %c0_i32_1 = arith.constant 0 : i32
    return %c0_i32, %c0_i32_0 : i32, i32
  }
  func.func @transform_4(%arg0: i32, %arg1: memref<8xi32, #tpu.memory_space<smem>>) -> (i32, i32) {
    %c0_i32 = arith.constant 0 : i32
    %c0_i32_0 = arith.constant 0 : i32
    %c0_i32_1 = arith.constant 0 : i32
    return %c0_i32, %c0_i32_0 : i32, i32
  }
  func.func @transform_5(%arg0: i32, %arg1: memref<8xi32, #tpu.memory_space<smem>>) -> (i32, i32) {
    %c0_i32 = arith.constant 0 : i32
    %c0_i32_0 = arith.constant 0 : i32
    %c0_i32_1 = arith.constant 0 : i32
    return %c0_i32, %c0_i32_0 : i32, i32
  }
  func.func @transform_6(%arg0: i32, %arg1: memref<8xi32, #tpu.memory_space<smem>>) -> (i32, i32) {
    %c0_i32 = arith.constant 0 : i32
    %c0_i32_0 = arith.constant 0 : i32
    %c0_i32_1 = arith.constant 0 : i32
    return %c0_i32, %c0_i32_0 : i32, i32
  }
  func.func @transform_7(%arg0: i32, %arg1: memref<8xi32, #tpu.memory_space<smem>>) -> (i32, i32) {
    %c0_i32 = arith.constant 0 : i32
    %c0_i32_0 = arith.constant 0 : i32
    %c0_i32_1 = arith.constant 0 : i32
    return %c0_i32, %c0_i32_0 : i32, i32
  }
  func.func @transform_8(%arg0: i32, %arg1: memref<8xi32, #tpu.memory_space<smem>>) -> (i32, i32) {
    %c0_i32 = arith.constant 0 : i32
    %c0_i32_0 = arith.constant 0 : i32
    %c0_i32_1 = arith.constant 0 : i32
    return %c0_i32, %c0_i32_0 : i32, i32
  }
}

</mosaic_0001>

<bundles_post_ra>
// kernel: tpu_custom_call.1
= control target key start
LH: loop header
LB: loop body
LE: loop exit
PB: predicated region body
PF: predicated region fallthrough
CT: control target
= control target key end

     0   :  { %s1815_s0 = inlined_call_operand.hbm [shape: s32[8], index: 0, kind: input, shape index: {}]   ;;  %s1816_s1 = inlined_call_operand.vmem [shape: f32[64,32], index: 1, kind: input, shape index: {}]   ;;  %s1817_s2 = inlined_call_operand.vmem [shape: f32[1,32], index: 2, kind: input, shape index: {}]   ;;  %s1818_s3 = inlined_call_operand.vmem [shape: f32[32,128], index: 3, kind: input, shape index: {}]   ;;  %s1819_s4 = inlined_call_operand.vmem [shape: f32[32,128], index: 4, kind: input, shape index: {}]   ;;  %s1820_s5 = inlined_call_operand.vmem [shape: f32[1,128], index: 5, kind: input, shape index: {}]   ;;  %s1821_s6 = inlined_call_operand.vmem [shape: f32[32,128], index: 6, kind: input, shape index: {}]   ;;  %s1822_s7 = inlined_call_operand.vmem [shape: f32[1,128], index: 7, kind: input, shape index: {}]   ;;  %s1823_s8 = inlined_call_operand.hbm [shape: f32[8,128], index: 8, kind: output, shape index: {0}]   ;;  %s1824_s9 = inlined_call_operand.hbm [shape: f32[1,32], index: 9, kind: output, shape index: {1}]  }
   0x1   :  { %s1449_s11 = scalar_lea.hbm %s1815_s0, 16 }
   0x2   :  { %p1450_p0 = scmp.ne.s32.totalorder %s1815_s0, %s1449_s11  ;;  %p1453_p1 = scmp.lt.u32.totalorder %s1449_s11, %s1815_s0 }
   0x4   :  { %p1455_p2 = pnand %p1453_p1, %p1450_p0 }
   0x6   :  { %1458 = shalt.err (!%p1455_p2)  }
   0x7   :  { %s1509_s16 = smov [#allocation6]  }
   0x8   :  { %16 = dma.hbm_to_smem %s1815_s0, 16, %s1509_s16, [#allocation5] }
   0x9   :  { %1503 = dma.done.wait [#allocation5], 16 }
   0xa   :  { %1504 = vsyncadd [#allocation5], 4294967280 }
   0xb   :  { %18 = sfence }
   0xc   :  { %19 = vsyncpa [#allocation8], 0  ;;  %v77_v0 = vld [vmem:[%s1818_s3] sm:$0xff]  ;;  %v78_v1 = vld [vmem:[%s1818_s3 + $0x8] sm:$0xff]  ;;  %v1510_v3 = vmov 0.0|0.0   ;;  %vm1511_vm0 = vmmov 0  }
   0xd   :  { %v79_v2 = vld [vmem:[%s1818_s3 + $0x10] sm:$0xff]  ;;  %1328 = vmatprep.subr.bf16.mxu0 %v1510_v3  ;;  %v1329_v4 = vpack.c.bf16 %v78_v1, %v77_v0  ;;  %v80_v5 = vld [vmem:[%s1818_s3 + $0x18] sm:$0xff]  ;;  %v1512_v6 = vmov 0.0   ;;  %s35_s26 = sld [smem:[#allocation6]]  ;;  %s1141_s27 = sld [smem:[#allocation6 + $0x1]]  ;;  %1334 = vmatprep.subr.bf16.mxu1 %v1510_v3  ;;  %v163_v7 = vld [vmem:[%s1819_s4] sm:$0xff] }
   0xe   :  { %1226 = vmatprep.mubr.msk.f32.mxu0 %vm1511_vm0, %v1512_v6  ;;  %s1595_s28 = sld [smem:[#allocation6 + $0x2]]  ;;  %s1597_s29 = sld [smem:[#allocation6 + $0x3]]  ;;  %1237 = vmatprep.mubr.msk.f32.mxu1 %vm1511_vm0, %v1512_v6  ;;  %v1332_v8 = vpack.c.bf16 %v80_v5, %v79_v2  ;;  %v164_v9 = vld [vmem:[%s1819_s4 + $0x8] sm:$0xff]  ;;  %v165_v10 = vld [vmem:[%s1819_s4 + $0x10] sm:$0xff]  ;;  %v166_v12 = vld [vmem:[%s1819_s4 + $0x18] sm:$0xff] }
   0xf   :  { %1330 = vmatpush3.bf16.msra.mxu0 %v1329_v4  ;;  %s1605_s3 = sld [smem:[#allocation6 + $0x4]]  ;;  %s1607_s11 = sld [smem:[#allocation6 + $0x5]]  ;;  %v1620_v11 = vpack.c.bf16 %v164_v9, %v163_v7 }
  0x10   :  { %1331 = vmatprep.subr.bf16.mxu0 %v1510_v3  ;;  %s1616_s16 = sld [smem:[#allocation6 + $0x6]]  ;;  %s1618_s17 = sld [smem:[#allocation6 + $0x7]] }
  0x11   :  { %20 = vsyncpa [#allocation10], 0  ;;  %1336 = vmatpush3.bf16.msra.mxu1 %v1620_v11  ;;  %v1626_v13 = vpack.c.bf16 %v166_v12, %v165_v10  ;;  %vm39_vm1 = vcmask 253952   ;;  %v1646_v16 = vld [vmem:[%s1817_s2] sm:$0x1]  ;;  %vm88_vm2 = vcmask 261120   ;;  %v266_v48 = vlaneseq }
  0x12   :  { %1337 = vmatprep.subr.bf16.mxu1 %v1510_v3  ;;  %v1148_v34 = vld [vmem:[%s1820_s5] ss:$0 sm:$0xff]  ;;  %s1515_s5 = smov 96   ;;  %s1516_s14 = smov [#allocation9]  }
  0x13   :  { %1333 = vmatpush3.bf16.msra.mxu0 %v1332_v8  ;;  %s36_s22 = scalar_lea.vmem %s1816_s1, %s35_s26  ;;  %s42_s0 = scalar_lea.vmem %s1816_s1, %s1141_s27  ;;  %v267_v49 = vshrl.u32 %v266_v48, 7 }
  0x14   :  { %v37_v14 = vld [vmem:[%s36_s22] sm:$0x1]  ;;  %s47_s30 = scalar_lea.vmem %s1816_s1, %s1595_s28  ;;  %s52_s13 = scalar_lea.vmem %s1816_s1, %s1597_s29  ;;  %1340 = vmatprep.subr.bf16.mxu0 %v1510_v3 }
  0x15   :  { %v43_v15 = vld [vmem:[%s42_s0] sm:$0x1]  ;;  %v38_v17 = vmax.f32 %v37_v14, 0.0  ;;  %s57_s18 = scalar_lea.vmem %s1816_s1, %s1605_s3  ;;  %s62_s20 = scalar_lea.vmem %s1816_s1, %s1607_s11  ;;  %1339 = vmatpush3.bf16.msra.mxu1 %v1626_v13  ;;  %v268_v50 = vsub.s32 0, %v267_v49 }
  0x16   :  { %v44_v18 = vmax.f32 %v43_v15, 0.0  ;;  %v48_v19 = vld [vmem:[%s47_s30] sm:$0x1]  ;;  %s67_s21 = scalar_lea.vmem %s1816_s1, %s1616_s16  ;;  %s72_s24 = scalar_lea.vmem %s1816_s1, %s1618_s17  ;;  %1346 = vmatprep.subr.bf16.mxu1 %v1510_v3 }
  0x17   :  { %v53_v20 = vld [vmem:[%s52_s13] sm:$0x1]  ;;  %v49_v21 = vmax.f32 %v48_v19, 0.0  ;;  %40 = vst.msk [vmem:[#allocation2] sm:$0x1] %vm39_vm1, %v38_v17  ;;  %s1513_s11 = smov 32   ;;  %v269_v52 = vrot.slane %v1646_v16, %v268_v50 }
  0x18   :  { %v54_v22 = vmax.f32 %v53_v20, 0.0  ;;  %v58_v23 = vld [vmem:[%s57_s18] sm:$0x1]  ;;  %45 = vst.msk [vmem:[#allocation2 + $0x1] sm:$0x1] %vm39_vm1, %v44_v18  ;;  %1238 = vmatmul.mubr.msk.f32.vlgmr.msra.gmra.mrb[0].mxu1 %vm88_vm2, %v1646_v16  ;;  %s1514_s16 = smov 64  }
  0x19   :  { %v63_v24 = vld [vmem:[%s62_s20] sm:$0x1]  ;;  %v59_v25 = vmax.f32 %v58_v23, 0.0  ;;  %50 = vst.msk [vmem:[#allocation2 + $0x2] sm:$0x1] %vm39_vm1, %v49_v21  ;;  %1348 = vmatpush3.bf16.msra.mxu1 %v1620_v11  ;;  %1259 = vmatprep.mubr.msk.f32.mxu1 %vm1511_vm0, %v1512_v6  ;;  %s1121_s27 = sshll.u32 %s1516_s14, 4  ;;  %s1122_s27 = int_to_ptr.vmem [resolvable:$true] %s1121_s27 }
  0x1a   :  { %v64_v26 = vmax.f32 %v63_v24, 0.0  ;;  %v68_v27 = vld [vmem:[%s67_s21] sm:$0x1]  ;;  %55 = vst.msk [vmem:[#allocation2 + $0x3] sm:$0x1] %vm39_vm1, %v54_v22  ;;  %1349 = vmatprep.subr.bf16.mxu1 %v1510_v3  ;;  %s1459_s15 = scalar_lea.vmem %s1122_s27, 16  ;;  %p1464_p4 = scmp.lt.s32.totalorder %s1122_s27, %s1122_s27 }
  0x1b   :  { %v73_v28 = vld [vmem:[%s72_s24] sm:$0x1]  ;;  %v69_v29 = vmax.f32 %v68_v27, 0.0  ;;  %60 = vst.msk [vmem:[#allocation2 + $0x4] sm:$0x1] %vm39_vm1, %v59_v25  ;;  %p1460_p3 = scmp.ne.s32.totalorder %s1122_s27, %s1459_s15  ;;  %s1463_s18 = scalar_lea.vmem %s1122_s27, 32 }
  0x1c   :  { %v74_v30 = vmax.f32 %v73_v28, 0.0  ;;  %65 = vst.msk [vmem:[#allocation2 + $0x5] sm:$0x1] %vm39_vm1, %v64_v26  ;;  %p1465_p5 = scmp.lt.s32.totalorder %s1463_s18, %s1459_s15 }
  0x1d   :  { %70 = vst.msk [vmem:[#allocation2 + $0x6] sm:$0x1] %vm39_vm1, %v69_v29  ;;  %1351 = vmatpush3.bf16.msra.mxu1 %v1626_v13 }
  0x1e   :  { %75 = vst.msk [vmem:[#allocation2 + $0x7] sm:$0x1] %vm39_vm1, %v74_v30  ;;  %1358 = vmatprep.subr.bf16.mxu1 %v1510_v3  ;;  %p1466_p6 = por %p1465_p5, %p1464_p4 }
  0x20   :  { %p1467_p7 = pnand %p1466_p6, %p1460_p3 }
  0x25   :  { %v76_v31 = vld [vmem:[#allocation2] sm:$0xff] }
  0x26   :  { %1227 = vmatmul.mubr.msk.f32.vlgmr.msra.gmra.mrb[0].mxu0 %vm88_vm2, %v76_v31 }
  0x27   :  { %1342 = vmatpush3.bf16.msra.mxu0 %v1620_v11  ;;  %1248 = vmatprep.mubr.msk.f32.mxu0 %vm1511_vm0, %v1512_v6 }
  0x28   :  { %1343 = vmatprep.subr.bf16.mxu0 %v1510_v3 }
  0x2b   :  { %1345 = vmatpush3.bf16.msra.mxu0 %v1626_v13 }
  0x2c   :  { %1352 = vmatprep.subr.bf16.mxu0 %v1510_v3 }
  0xeb   :  { %v238_v32 = vpop.f32.mrb[0].mxu1 }
  0xec   :  { %v1239_v33 = vpop.f32.mrb[1].mxu1 }
  0xf9   :  { %v158_v35 = vpop.f32.mrb[0].mxu0 }
  0xfa   :  { %v159_v36 = vadd.f32 %v1148_v34, %v158_v35  ;;  %v1228_v37 = vpop.f32.mrb[1].mxu0 }
  0xfc   :  { %162 = vst [vmem:[#allocation3] sm:$0xff] %v159_v36 }
 0x103   :  { %v168_v38 = vld [vmem:[#allocation3] sm:$0x1]  ;;  %v280_v60 = vld [vmem:[#allocation3 + $0x1] sm:$0x1]  ;;  %v384_v19 = vld [vmem:[#allocation3 + $0x2] sm:$0x1] }
 0x104   :  { %v242_v39 = vadd.f32 %v238_v32, %v168_v38  ;;  %v488_v38 = vld [vmem:[#allocation3 + $0x3] sm:$0x1] }
 0x106   :  { %250 = vrot.lane.b32.xlu0 %v242_v39, %s1513_s11  ;;  %v1151_v40 = vmul.f32 -1.442695, %v242_v39 }
 0x108   :  { %1397 = vpow2.f32 %v1151_v40 }
 0x112   :  { %v1398_v41 = vpop.eup %1397 }
 0x113   :  { %v246_v42 = vadd.f32 1.0, %v1398_v41 }
 0x115   :  { %1399 = vrcp.f32 %v246_v42 }
 0x11f   :  { %v1400_v43 = vpop.eup %1399 }
 0x120   :  { %v260_v54 = vsub.f32 1.0, %v1400_v43 }
 0x178   :  { %v251_v44 = vpop.permute.xlu0 %250 }
 0x179   :  { %v253_v45 = vmul.f32 %v1400_v43, %v251_v44 }
 0x17b   :  { %255 = vrot.lane.b32.xlu0 %v253_v45, %s1514_s16 }
 0x1ed   :  { %v256_v46 = vpop.permute.xlu0 %255 }
 0x1ee   :  { %v258_v47 = vadd.f32 %v256_v46, %v242_v39 }
 0x1f0   :  { %1401 = vtanh.f32 %v258_v47 }
 0x1fa   :  { %v1402_v51 = vpop.eup %1401 }
 0x1fb   :  { %262 = vrot.lane.b32.xlu1 %v1402_v51, %s1515_s5 }
 0x1ff   :  { %270 = vrot.lane.b32.xlu1 %v269_v52, %s1513_s11 }
 0x26d   :  { %v263_v53 = vpop.permute.xlu1 %262 }
 0x26e   :  { %v265_v56 = vmul.f32 %v263_v53, %v260_v54 }
 0x271   :  { %v271_v55 = vpop.permute.xlu1 %270 }
 0x272   :  { %v273_v57 = vmul.f32 %v1400_v43, %v271_v55 }
 0x274   :  { %v274_v58 = vadd.f32 %v273_v57, %v265_v56  ;;  %v592_v57 = vld [vmem:[#allocation3 + $0x4] sm:$0x1] }
 0x276   :  { %276 = vrot.lane.b32.xlu0 %v274_v58, %s1515_s5 }
 0x2e8   :  { %v277_v59 = vpop.permute.xlu0 %276 }
 0x2e9   :  { %279 = vst.msk [vmem:[#allocation4] sm:$0x1] %vm39_vm1, %v277_v59  ;;  %1249 = vmatmul.mubr.msk.f32.vlgmr.msra.gmra.mrb[2].mxu0 %vm88_vm2, %v277_v59 }
 0x2ea   :  { %1354 = vmatpush3.bf16.msra.mxu0 %v1620_v11  ;;  %1270 = vmatprep.mubr.msk.f32.mxu0 %vm1511_vm0, %v1512_v6 }
 0x2eb   :  { %1355 = vmatprep.subr.bf16.mxu0 %v1510_v3 }
 0x2ee   :  { %1357 = vmatpush3.bf16.msra.mxu0 %v1626_v13 }
 0x2ef   :  { %1364 = vmatprep.subr.bf16.mxu0 %v1510_v3 }
 0x3bc   :  { %v349_v61 = vpop.f32.mrb[2].mxu0 }
 0x3bd   :  { %v353_v62 = vadd.f32 %v349_v61, %v280_v60  ;;  %v1250_v63 = vpop.f32.mrb[3].mxu0 }
 0x3bf   :  { %361 = vrot.lane.b32.xlu1 %v353_v62, %s1513_s11  ;;  %v1153_v0 = vmul.f32 -1.442695, %v353_v62 }
 0x3c1   :  { %1403 = vpow2.f32 %v1153_v0 }
 0x3cb   :  { %v1404_v1 = vpop.eup %1403 }
 0x3cc   :  { %v357_v2 = vadd.f32 1.0, %v1404_v1 }
 0x3ce   :  { %1405 = vrcp.f32 %v357_v2 }
 0x3d8   :  { %v1406_v4 = vpop.eup %1405 }
 0x3d9   :  { %v371_v12 = vsub.f32 1.0, %v1406_v4  ;;  %v377_v15 = vmul.f32 %v1406_v4, %v274_v58 }
 0x431   :  { %v362_v5 = vpop.permute.xlu1 %361 }
 0x432   :  { %v364_v7 = vmul.f32 %v1406_v4, %v362_v5 }
 0x434   :  { %366 = vrot.lane.b32.xlu0 %v364_v7, %s1514_s16 }
 0x4a6   :  { %v367_v8 = vpop.permute.xlu0 %366 }
 0x4a7   :  { %v369_v9 = vadd.f32 %v367_v8, %v353_v62 }
 0x4a9   :  { %1407 = vtanh.f32 %v369_v9 }
 0x4b3   :  { %v1408_v10 = vpop.eup %1407 }
 0x4b4   :  { %373 = vrot.lane.b32.xlu1 %v1408_v10, %s1515_s5 }
 0x526   :  { %v374_v14 = vpop.permute.xlu1 %373 }
 0x527   :  { %v376_v16 = vmul.f32 %v374_v14, %v371_v12 }
 0x529   :  { %v378_v17 = vadd.f32 %v377_v15, %v376_v16  ;;  %v696_v16 = vld [vmem:[#allocation3 + $0x5] sm:$0x1] }
 0x52b   :  { %380 = vrot.lane.b32.xlu0 %v378_v17, %s1515_s5 }
 0x59d   :  { %v381_v18 = vpop.permute.xlu0 %380 }
 0x59e   :  { %383 = vst.msk [vmem:[#allocation4 + $0x1] sm:$0x1] %vm39_vm1, %v381_v18  ;;  %1260 = vmatmul.mubr.msk.f32.vlgmr.msra.gmra.mrb[2].mxu1 %vm88_vm2, %v381_v18 }
 0x59f   :  { %1360 = vmatpush3.bf16.msra.mxu1 %v1620_v11  ;;  %1281 = vmatprep.mubr.msk.f32.mxu1 %vm1511_vm0, %v1512_v6 }
 0x5a0   :  { %1361 = vmatprep.subr.bf16.mxu1 %v1510_v3 }
 0x5a3   :  { %1363 = vmatpush3.bf16.msra.mxu1 %v1626_v13 }
 0x5a4   :  { %1370 = vmatprep.subr.bf16.mxu1 %v1510_v3 }
 0x671   :  { %v453_v20 = vpop.f32.mrb[2].mxu1 }
 0x672   :  { %v457_v21 = vadd.f32 %v453_v20, %v384_v19  ;;  %v1261_v22 = vpop.f32.mrb[3].mxu1 }
 0x674   :  { %465 = vrot.lane.b32.xlu1 %v457_v21, %s1513_s11  ;;  %v1155_v23 = vmul.f32 -1.442695, %v457_v21 }
 0x676   :  { %1409 = vpow2.f32 %v1155_v23 }
 0x680   :  { %v1410_v24 = vpop.eup %1409 }
 0x681   :  { %v461_v25 = vadd.f32 1.0, %v1410_v24 }
 0x683   :  { %1411 = vrcp.f32 %v461_v25 }
 0x68d   :  { %v1412_v26 = vpop.eup %1411 }
 0x68e   :  { %v475_v32 = vsub.f32 1.0, %v1412_v26  ;;  %v481_v34 = vmul.f32 %v1412_v26, %v378_v17 }
 0x6e6   :  { %v466_v27 = vpop.permute.xlu1 %465 }
 0x6e7   :  { %v468_v28 = vmul.f32 %v1412_v26, %v466_v27 }
 0x6e9   :  { %470 = vrot.lane.b32.xlu0 %v468_v28, %s1514_s16 }
 0x75b   :  { %v471_v29 = vpop.permute.xlu0 %470 }
 0x75c   :  { %v473_v30 = vadd.f32 %v471_v29, %v457_v21 }
 0x75e   :  { %1413 = vtanh.f32 %v473_v30 }
 0x768   :  { %v1414_v31 = vpop.eup %1413 }
 0x769   :  { %477 = vrot.lane.b32.xlu1 %v1414_v31, %s1515_s5 }
 0x7db   :  { %v478_v33 = vpop.permute.xlu1 %477 }
 0x7dc   :  { %v480_v35 = vmul.f32 %v478_v33, %v475_v32  ;;  %v800_v33 = vld [vmem:[#allocation3 + $0x6] sm:$0x1] }
 0x7de   :  { %v482_v36 = vadd.f32 %v481_v34, %v480_v35 }
 0x7e0   :  { %484 = vrot.lane.b32.xlu0 %v482_v36, %s1515_s5 }
 0x852   :  { %v485_v37 = vpop.permute.xlu0 %484 }
 0x853   :  { %487 = vst.msk [vmem:[#allocation4 + $0x2] sm:$0x1] %vm39_vm1, %v485_v37  ;;  %1271 = vmatmul.mubr.msk.f32.vlgmr.msra.gmra.mrb[4].mxu0 %vm88_vm2, %v485_v37 }
 0x854   :  { %1366 = vmatpush3.bf16.msra.mxu0 %v1620_v11  ;;  %1292 = vmatprep.mubr.msk.f32.mxu0 %vm1511_vm0, %v1512_v6 }
 0x855   :  { %1367 = vmatprep.subr.bf16.mxu0 %v1510_v3 }
 0x858   :  { %1369 = vmatpush3.bf16.msra.mxu0 %v1626_v13 }
 0x859   :  { %1376 = vmatprep.subr.bf16.mxu0 %v1510_v3 }
 0x926   :  { %v557_v39 = vpop.f32.mrb[4].mxu0 }
 0x927   :  { %v561_v40 = vadd.f32 %v557_v39, %v488_v38  ;;  %v1272_v41 = vpop.f32.mrb[5].mxu0 }
 0x929   :  { %569 = vrot.lane.b32.xlu1 %v561_v40, %s1513_s11  ;;  %v1157_v42 = vmul.f32 -1.442695, %v561_v40 }
 0x92b   :  { %1415 = vpow2.f32 %v1157_v42 }
 0x935   :  { %v1416_v43 = vpop.eup %1415 }
 0x936   :  { %v565_v44 = vadd.f32 1.0, %v1416_v43 }
 0x938   :  { %1417 = vrcp.f32 %v565_v44 }
 0x942   :  { %v1418_v45 = vpop.eup %1417 }
 0x943   :  { %v579_v51 = vsub.f32 1.0, %v1418_v45  ;;  %v585_v53 = vmul.f32 %v1418_v45, %v482_v36 }
 0x99b   :  { %v570_v46 = vpop.permute.xlu1 %569 }
 0x99c   :  { %v572_v47 = vmul.f32 %v1418_v45, %v570_v46 }
 0x99e   :  { %574 = vrot.lane.b32.xlu0 %v572_v47, %s1514_s16 }
 0xa10   :  { %v575_v48 = vpop.permute.xlu0 %574 }
 0xa11   :  { %v577_v49 = vadd.f32 %v575_v48, %v561_v40 }
 0xa13   :  { %1419 = vtanh.f32 %v577_v49 }
 0xa1d   :  { %v1420_v50 = vpop.eup %1419 }
 0xa1e   :  { %581 = vrot.lane.b32.xlu1 %v1420_v50, %s1515_s5 }
 0xa90   :  { %v582_v52 = vpop.permute.xlu1 %581 }
 0xa91   :  { %v584_v54 = vmul.f32 %v582_v52, %v579_v51  ;;  %v904_v51 = vld [vmem:[#allocation3 + $0x7] sm:$0x1] }
 0xa93   :  { %v586_v55 = vadd.f32 %v585_v53, %v584_v54 }
 0xa95   :  { %588 = vrot.lane.b32.xlu0 %v586_v55, %s1515_s5 }
 0xb07   :  { %v589_v56 = vpop.permute.xlu0 %588 }
 0xb08   :  { %591 = vst.msk [vmem:[#allocation4 + $0x3] sm:$0x1] %vm39_vm1, %v589_v56  ;;  %1282 = vmatmul.mubr.msk.f32.vlgmr.msra.gmra.mrb[4].mxu1 %vm88_vm2, %v589_v56 }
 0xb09   :  { %1372 = vmatpush3.bf16.msra.mxu1 %v1620_v11  ;;  %1303 = vmatprep.mubr.msk.f32.mxu1 %vm1511_vm0, %v1512_v6 }
 0xb0a   :  { %1373 = vmatprep.subr.bf16.mxu1 %v1510_v3 }
 0xb0d   :  { %1375 = vmatpush3.bf16.msra.mxu1 %v1626_v13 }
 0xb0e   :  { %1382 = vmatprep.subr.bf16.mxu1 %v1510_v3 }
 0xbdb   :  { %v661_v58 = vpop.f32.mrb[4].mxu1 }
 0xbdc   :  { %v665_v59 = vadd.f32 %v661_v58, %v592_v57  ;;  %v1283_v60 = vpop.f32.mrb[5].mxu1 }
 0xbde   :  { %673 = vrot.lane.b32.xlu1 %v665_v59, %s1513_s11  ;;  %v1159_v61 = vmul.f32 -1.442695, %v665_v59 }
 0xbe0   :  { %1421 = vpow2.f32 %v1159_v61 }
 0xbea   :  { %v1422_v62 = vpop.eup %1421 }
 0xbeb   :  { %v669_v63 = vadd.f32 1.0, %v1422_v62 }
 0xbed   :  { %1423 = vrcp.f32 %v669_v63 }
 0xbf7   :  { %v1424_v0 = vpop.eup %1423 }
 0xbf8   :  { %v683_v8 = vsub.f32 1.0, %v1424_v0  ;;  %v689_v10 = vmul.f32 %v1424_v0, %v586_v55 }
 0xc50   :  { %v674_v1 = vpop.permute.xlu1 %673 }
 0xc51   :  { %v676_v2 = vmul.f32 %v1424_v0, %v674_v1  ;;  %v1010_v0 = vld [vmem:[%s1821_s6] sm:$0xff]  ;;  %v1011_v1 = vld [vmem:[%s1821_s6 + $0x8] sm:$0xff] }
 0xc53   :  { %678 = vrot.lane.b32.xlu0 %v676_v2, %s1514_s16  ;;  %v1012_v2 = vld [vmem:[%s1821_s6 + $0x10] sm:$0xff] }
 0xcc5   :  { %v679_v4 = vpop.permute.xlu0 %678 }
 0xcc6   :  { %v681_v5 = vadd.f32 %v679_v4, %v665_v59  ;;  %v1383_v4 = vpack.c.bf16 %v1011_v1, %v1010_v0 }
 0xcc8   :  { %1425 = vtanh.f32 %v681_v5  ;;  %v1013_v5 = vld [vmem:[%s1821_s6 + $0x18] sm:$0xff] }
 0xcd2   :  { %v1426_v7 = vpop.eup %1425 }
 0xcd3   :  { %685 = vrot.lane.b32.xlu1 %v1426_v7, %s1515_s5  ;;  %v1386_v7 = vpack.c.bf16 %v1013_v5, %v1012_v2 }
 0xd45   :  { %v686_v9 = vpop.permute.xlu1 %685 }
 0xd46   :  { %v688_v12 = vmul.f32 %v686_v9, %v683_v8 }
 0xd48   :  { %v690_v14 = vadd.f32 %v689_v10, %v688_v12 }
 0xd4a   :  { %692 = vrot.lane.b32.xlu0 %v690_v14, %s1515_s5 }
 0xdbc   :  { %v693_v15 = vpop.permute.xlu0 %692 }
 0xdbd   :  { %695 = vst.msk [vmem:[#allocation4 + $0x4] sm:$0x1] %vm39_vm1, %v693_v15  ;;  %1293 = vmatmul.mubr.msk.f32.vlgmr.msra.gmra.mrb[6].mxu0 %vm88_vm2, %v693_v15 }
 0xdbe   :  { %1378 = vmatpush3.bf16.msra.mxu0 %v1620_v11  ;;  %1314 = vmatprep.mubr.msk.f32.mxu0 %vm1511_vm0, %v1512_v6 }
 0xdbf   :  { %1379 = vmatprep.subr.bf16.mxu0 %v1510_v3 }
 0xdc2   :  { %1381 = vmatpush3.bf16.msra.mxu0 %v1626_v13 }
 0xe90   :  { %v765_v17 = vpop.f32.mrb[6].mxu0 }
 0xe91   :  { %v769_v18 = vadd.f32 %v765_v17, %v696_v16  ;;  %v1294_v19 = vpop.f32.mrb[7].mxu0 }
 0xe93   :  { %777 = vrot.lane.b32.xlu1 %v769_v18, %s1513_s11  ;;  %v1161_v20 = vmul.f32 -1.442695, %v769_v18 }
 0xe95   :  { %1427 = vpow2.f32 %v1161_v20 }
 0xe9f   :  { %v1428_v21 = vpop.eup %1427 }
 0xea0   :  { %v773_v22 = vadd.f32 1.0, %v1428_v21 }
 0xea2   :  { %1429 = vrcp.f32 %v773_v22 }
 0xeac   :  { %v1430_v23 = vpop.eup %1429 }
 0xead   :  { %v787_v27 = vsub.f32 1.0, %v1430_v23  ;;  %v793_v29 = vmul.f32 %v1430_v23, %v690_v14 }
 0xf05   :  { %v778_v11 = vpop.permute.xlu1 %777 }
 0xf06   :  { %v780_v24 = vmul.f32 %v1430_v23, %v778_v11 }
 0xf08   :  { %782 = vrot.lane.b32.xlu0 %v780_v24, %s1514_s16 }
 0xf7a   :  { %v783_v25 = vpop.permute.xlu0 %782 }
 0xf7b   :  { %v785_v26 = vadd.f32 %v783_v25, %v769_v18 }
 0xf7d   :  { %1431 = vtanh.f32 %v785_v26 }
 0xf87   :  { %v1432_v13 = vpop.eup %1431 }
 0xf88   :  { %789 = vrot.lane.b32.xlu1 %v1432_v13, %s1515_s5 }
 0xffa   :  { %v790_v28 = vpop.permute.xlu1 %789 }
 0xffb   :  { %v792_v30 = vmul.f32 %v790_v28, %v787_v27 }
 0xffd   :  { %v794_v31 = vadd.f32 %v793_v29, %v792_v30 }
 0xfff   :  { %796 = vrot.lane.b32.xlu0 %v794_v31, %s1515_s5 }
0x1071   :  { %v797_v32 = vpop.permute.xlu0 %796 }
0x1072   :  { %799 = vst.msk [vmem:[#allocation4 + $0x5] sm:$0x1] %vm39_vm1, %v797_v32  ;;  %1304 = vmatmul.mubr.msk.f32.vlgmr.msra.gmra.mrb[6].mxu1 %vm88_vm2, %v797_v32 }
0x1073   :  { %1325 = vmatprep.mubr.msk.f32.mxu1 %vm1511_vm0, %v1512_v6  ;;  %1384 = vmatpush3.bf16.msra.mxu1 %v1383_v4 }
0x1074   :  { %1385 = vmatprep.subr.bf16.mxu1 %v1510_v3  ;;  %v1166_v3 = vld [vmem:[%s1822_s7] ss:$0 sm:$0xff] }
0x1077   :  { %1387 = vmatpush3.bf16.msra.mxu1 %v1386_v7 }
0x1145   :  { %v869_v34 = vpop.f32.mrb[6].mxu1 }
0x1146   :  { %v873_v35 = vadd.f32 %v869_v34, %v800_v33  ;;  %v1305_v36 = vpop.f32.mrb[7].mxu1 }
0x1148   :  { %881 = vrot.lane.b32.xlu1 %v873_v35, %s1513_s11  ;;  %v1163_v37 = vmul.f32 -1.442695, %v873_v35 }
0x114a   :  { %1433 = vpow2.f32 %v1163_v37 }
0x1154   :  { %v1434_v38 = vpop.eup %1433 }
0x1155   :  { %v877_v39 = vadd.f32 1.0, %v1434_v38 }
0x1157   :  { %1435 = vrcp.f32 %v877_v39 }
0x1161   :  { %v1436_v40 = vpop.eup %1435 }
0x1162   :  { %v891_v45 = vsub.f32 1.0, %v1436_v40  ;;  %v897_v47 = vmul.f32 %v1436_v40, %v794_v31 }
0x11ba   :  { %v882_v41 = vpop.permute.xlu1 %881 }
0x11bb   :  { %v884_v42 = vmul.f32 %v1436_v40, %v882_v41 }
0x11bd   :  { %886 = vrot.lane.b32.xlu0 %v884_v42, %s1514_s16 }
0x122f   :  { %v887_v43 = vpop.permute.xlu0 %886 }
0x1230   :  { %v889_v44 = vadd.f32 %v887_v43, %v873_v35 }
0x1232   :  { %1437 = vtanh.f32 %v889_v44 }
0x123c   :  { %v1438_v6 = vpop.eup %1437 }
0x123d   :  { %893 = vrot.lane.b32.xlu1 %v1438_v6, %s1515_s5 }
0x12af   :  { %v894_v46 = vpop.permute.xlu1 %893 }
0x12b0   :  { %v896_v48 = vmul.f32 %v894_v46, %v891_v45 }
0x12b2   :  { %v898_v49 = vadd.f32 %v897_v47, %v896_v48 }
0x12b4   :  { %900 = vrot.lane.b32.xlu0 %v898_v49, %s1515_s5 }
0x1326   :  { %v901_v50 = vpop.permute.xlu0 %900 }
0x1327   :  { %903 = vst.msk [vmem:[#allocation4 + $0x6] sm:$0x1] %vm39_vm1, %v901_v50  ;;  %1315 = vmatmul.mubr.msk.f32.vlgmr.msra.gmra.mrb[8].mxu0 %vm88_vm2, %v901_v50 }
0x13fa   :  { %v973_v52 = vpop.f32.mrb[8].mxu0 }
0x13fb   :  { %v977_v53 = vadd.f32 %v973_v52, %v904_v51  ;;  %v1316_v54 = vpop.f32.mrb[9].mxu0 }
0x13fd   :  { %985 = vrot.lane.b32.xlu1 %v977_v53, %s1513_s11  ;;  %v1165_v55 = vmul.f32 -1.442695, %v977_v53 }
0x13ff   :  { %1439 = vpow2.f32 %v1165_v55 }
0x1409   :  { %v1440_v56 = vpop.eup %1439 }
0x140a   :  { %v981_v57 = vadd.f32 1.0, %v1440_v56 }
0x140c   :  { %1441 = vrcp.f32 %v981_v57 }
0x1416   :  { %v1442_v58 = vpop.eup %1441 }
0x1417   :  { %v995_v8 = vsub.f32 1.0, %v1442_v58  ;;  %v1001_v10 = vmul.f32 %v1442_v58, %v898_v49 }
0x146f   :  { %v986_v59 = vpop.permute.xlu1 %985 }
0x1470   :  { %v988_v60 = vmul.f32 %v1442_v58, %v986_v59 }
0x1472   :  { %990 = vrot.lane.b32.xlu0 %v988_v60, %s1514_s16 }
0x14e4   :  { %v991_v61 = vpop.permute.xlu0 %990 }
0x14e5   :  { %v993_v62 = vadd.f32 %v991_v61, %v977_v53 }
0x14e7   :  { %1443 = vtanh.f32 %v993_v62 }
0x14f1   :  { %v1444_v63 = vpop.eup %1443 }
0x14f2   :  { %997 = vrot.lane.b32.xlu1 %v1444_v63, %s1515_s5 }
0x1564   :  { %v998_v9 = vpop.permute.xlu1 %997 }
0x1565   :  { %v1000_v12 = vmul.f32 %v998_v9, %v995_v8 }
0x1567   :  { %v1002_v14 = vadd.f32 %v1001_v10, %v1000_v12 }
0x1569   :  { %1004 = vrot.lane.b32.xlu0 %v1002_v14, %s1515_s5 }
0x15db   :  { %v1005_v15 = vpop.permute.xlu0 %1004 }
0x15dc   :  { %1007 = vst.msk [vmem:[#allocation4 + $0x7] sm:$0x1] %vm39_vm1, %v1005_v15  ;;  %1008 = vst.msk [vmem:[#allocation9] sm:$0x1] %vm39_vm1, %v1005_v15 }
0x15e3   :  { %v1009_v16 = vld [vmem:[#allocation4] sm:$0xff] }
0x15e4   :  { %1326 = vmatmul.mubr.msk.f32.vlgmr.msra.gmra.mrb[8].mxu1 %vm88_vm2, %v1009_v16 }
0x16b7   :  { %v1090_v17 = vpop.f32.mrb[8].mxu1 }
0x16b8   :  { %v1091_v18 = vadd.f32 %v1166_v3, %v1090_v17  ;;  %v1327_v19 = vpop.f32.mrb[9].mxu1 }
0x16ba   :  { %1094 = vmax.xlane.f32.xlu1 %v1091_v18 }
0x1747   :  { %v1095_v20 = vpop.xlane.xlu1 %1094 }
0x1748   :  { %v1096_v21 = vsub.f32 %v1091_v18, %v1095_v20 }
0x174a   :  { %v1097_v22 = vmul.f32 1.442695, %v1096_v21 }
0x174c   :  { %1445 = vpow2.f32 %v1097_v22 }
0x1756   :  { %v1446_v23 = vpop.eup %1445 }
0x1757   :  { %1099 = vadd.xlane.f32.xlu0 %v1446_v23 }
0x1758   :  { %1470 = shalt.err (!%p1467_p7)
}
0x1759   :  { %s1471_s19 = scalar_lea.hbm %s1824_s9, 16 }
0x175a   :  { %p1472_p8 = scmp.ne.s32.totalorder %s1824_s9, %s1471_s19  ;;  %p1475_p9 = scmp.lt.u32.totalorder %s1471_s19, %s1824_s9 }
0x175c   :  { %p1477_p10 = pnand %p1475_p9, %p1472_p8 }
0x175e   :  { %1480 = shalt.err (!%p1477_p10)
}
0x175f   :  { %1124 = dma.vmem_to_hbm [thread:$0]  %s1122_s27, 16, %s1824_s9, [#allocation10]  }
0x1760   :  { %s1517_s24 = smov [#allocation7]  }
0x1761   :  { %s1111_s1 = sshll.u32 %s1517_s24, 4  ;;  %s1112_s1 = int_to_ptr.vmem [resolvable:$true] %s1111_s1 }
0x1762   :  { %s1481_s3 = scalar_lea.vmem %s1112_s1, 128  ;;  %p1486_p12 = scmp.lt.s32.totalorder %s1112_s1, %s1112_s1 }
0x1763   :  { %p1482_p11 = scmp.ne.s32.totalorder %s1112_s1, %s1481_s3  ;;  %p1487_p13 = scmp.lt.s32.totalorder %s1481_s3, %s1481_s3 }
0x1765   :  { %p1488_p0 = por %p1487_p13, %p1486_p12 }
0x1767   :  { %p1489_p1 = pnand %p1488_p0, %p1482_p11 }
0x17e4   :  { %v1100_v11 = vpop.xlane.xlu0 %1099 }
0x17e5   :  { %1447 = vlog2.f32 %v1100_v11 }
0x17ef   :  { %v1448_v24 = vpop.eup %1447 }
0x17f0   :  { %v1102_v25 = vmul.f32 0.6931472, %v1448_v24 }
0x17f2   :  { %v1103_v26 = vsub.f32 %v1096_v21, %v1102_v25 }
0x17f4   :  { %1104 = vst [vmem:[#allocation7] sm:$0xff] %v1103_v26 }
0x17f5   :  { %1492 = shalt.err (!%p1489_p1)
}
0x17f6   :  { %s1493_s9 = scalar_lea.hbm %s1823_s8, 128 }
0x17f7   :  { %p1494_p2 = scmp.ne.s32.totalorder %s1823_s8, %s1493_s9  ;;  %p1497_p3 = scmp.lt.u32.totalorder %s1493_s9, %s1823_s8 }
0x17f9   :  { %p1499_p4 = pnand %p1497_p3, %p1494_p2 }
0x17fb   :  { %1502 = shalt.err (!%p1499_p4)
}
0x17fc   :  { %1114 = dma.vmem_to_hbm [thread:$0]  %s1112_s1, 128, %s1823_s8, [#allocation8]  }
0x17fd   :  { %1505 = dma.done.wait [#allocation8], 128  }
0x17fe   :  { %1506 = vsyncadd [#allocation8], 4294967168 }
0x17ff   :  { %1507 = dma.done.wait [#allocation10], 16  }
0x1800   :  { %1508 = vsyncadd [#allocation10], 4294967280 }
0x1801   :  { %1131 = vsyncpa [#allocation8], 1 }
0x1802   :  { %1132 = vsyncpa [#allocation10], 1 }

</bundles_post_ra>
